<compile_context>
chip_gen: v5e
topology: v5e:2x2
jax: 0.10.0
libtpu: 0.0.40
codegen_flags: <defaults>
</compile_context>

<pallas_src>
import jax
import jax.numpy as jnp
from jax.experimental import pallas as pl
from jax.experimental.pallas import tpu as pltpu


def _fused_head_kernel(x_ref, w_ref, b_ref, o_ref):
    # x_ref: [TR, H] rows of the flattened sequence output.
    # w_ref: [H, 8]  fused classifier weights (resident).
    # b_ref: [1, 8]  fused bias (f32, resident).
    acc = jnp.dot(x_ref[...], w_ref[...], preferred_element_type=jnp.float32)
    o_ref[...] = (acc + b_ref[...]).astype(o_ref.dtype)


def _choose_row_tile(n_rows, hidden, itemsize,
                     max_rows=4096, target_buffer_bytes=12 * 1024 * 1024):
    """Largest row tile whose double-buffered input fits comfortably in VMEM."""
    tr = target_buffer_bytes // max(1, hidden * itemsize)
    tr = min(int(tr), max_rows, n_rows)
    tr = max(8, (tr // 8) * 8)          # 8-sublane alignment
    return tr


def st2_head(sequence_output, w_cls, b_cls, w_sig, b_sig, *, row_tile=None):
    """sequence_output: [B, S, H]; w_cls: [6, H]; b_cls: [6]; w_sig: [2, H];
    b_sig: [2].  Returns (token_logits [B, S, 6], sig_logits [B, 2])."""
    B, S, H = sequence_output.shape
    N = B * S
    x = sequence_output.reshape(N, H)            # contiguous reshape: free

    # Fuse the two heads: one [H, 8] weight, one [1, 8] bias.
    w = jnp.concatenate([w_cls, w_sig], axis=0).T.astype(sequence_output.dtype)  # [H, 8]
    b = jnp.concatenate([b_cls, b_sig], axis=0).reshape(1, 8).astype(jnp.float32)

    itemsize = x.dtype.itemsize
    tr = row_tile if row_tile is not None else _choose_row_tile(N, H, itemsize)
    tr = max(8, min((tr // 8) * 8 if tr >= 8 else 8, N if N >= 8 else 8))
    n_tiles = pl.cdiv(N, tr)

    cost = pl.CostEstimate(
        flops=2 * N * H * 8,
        transcendentals=0,
        bytes_accessed=N * H * itemsize + N * 8 * itemsize + H * 8 * itemsize + 8 * 4,
    )

    out = pl.pallas_call(
        _fused_head_kernel,
        out_shape=jax.ShapeDtypeStruct((N, 8), sequence_output.dtype),
        grid_spec=pltpu.PrefetchScalarGridSpec(
            num_scalar_prefetch=0,
            grid=(n_tiles,),
            in_specs=[
                pl.BlockSpec((tr, H), lambda i: (i, 0)),
                pl.BlockSpec((H, 8), lambda i: (0, 0)),   # constant block: resident
                pl.BlockSpec((1, 8), lambda i: (0, 0)),   # constant block: resident
            ],
            out_specs=pl.BlockSpec((tr, 8), lambda i: (i, 0)),
        ),
        compiler_params=pltpu.CompilerParams(
            dimension_semantics=("parallel",),
            vmem_limit_bytes=32 * 1024 * 1024,
        ),
        cost_estimate=cost,
    )(x, w, b)

    fused = out.reshape(B, S, 8)
    token_logits = fused[..., 0:6]            # [B, S, 6]
    sig_logits = fused[:, 0, 6:8]             # [B, 2]: signal head applied to CLS rows
    return token_logits, sig_logits


def st2_forward(sequence_output, params,
                signal_classification=True, pretrained_signal_detector=False):
    """Replicates ST2ModelV2.forward given the encoder output.
    Dropout is identity at inference (module.eval())."""
    # TODO(synk): the RoBERTa encoder (self.model) itself is out of scope here.
    logits, sig_logits = st2_head(
        sequence_output,
        params["w_cls"], params["b_cls"],
        params["w_sig"], params["b_sig"],
    )
    # logits.split(1, dim=-1) + squeeze(-1)
    start_arg0_logits = logits[..., 0]
    end_arg0_logits   = logits[..., 1]
    start_arg1_logits = logits[..., 2]
    end_arg1_logits   = logits[..., 3]
    start_sig_logits  = logits[..., 4]
    end_sig_logits    = logits[..., 5]

    signal_classification_logits = None
    if signal_classification and not pretrained_signal_detector:
        signal_classification_logits = sig_logits

    return {
        "start_arg0_logits": start_arg0_logits,
        "end_arg0_logits": end_arg0_logits,
        "start_arg1_logits": start_arg1_logits,
        "end_arg1_logits": end_arg1_logits,
        "start_sig_logits": start_sig_logits,
        "end_sig_logits": end_sig_logits,
        "signal_classification_logits": signal_classification_logits,
    }


def init_params(key, hidden_size):
    # Deterministic nn.Linear-style init (uniform +/- 1/sqrt(fan_in)).
    k1, k2, k3, k4 = jax.random.split(key, 4)
    bound = 1.0 / jnp.sqrt(hidden_size)
    return {
        "w_cls": jax.random.uniform(k1, (6, hidden_size), jnp.float32, -bound, bound),
        "b_cls": jax.random.uniform(k2, (6,), jnp.float32, -bound, bound),
        "w_sig": jax.random.uniform(k3, (2, hidden_size), jnp.float32, -bound, bound),
        "b_sig": jax.random.uniform(k4, (2,), jnp.float32, -bound, bound),
    }


def _reference(sequence_output, params):
    ref_logits = (jnp.einsum("bsh,oh->bso", sequence_output, params["w_cls"])
                  + params["b_cls"])
    ref_sig = sequence_output[:, 0, :] @ params["w_sig"].T + params["b_sig"]
    return ref_logits, ref_sig


if __name__ == "__main__":
    key = jax.random.PRNGKey(0)
    k_seq, k_par, k_seq2 = jax.random.split(key, 3)

    # Small shapes consistent with the forward pass: batch=2, seq=8, hidden=32.
    B, S, H = 2, 8, 32
    sequence_output = jax.random.normal(k_seq, (B, S, H), jnp.float32)
    params = init_params(k_par, H)

    out = st2_forward(sequence_output, params)
    out = jax.tree_util.tree_map(jax.block_until_ready, out)

    ref_logits, ref_sig = _reference(sequence_output, params)
    assert jnp.allclose(out["start_arg0_logits"], ref_logits[..., 0], atol=1e-5)
    assert jnp.allclose(out["end_arg0_logits"],   ref_logits[..., 1], atol=1e-5)
    assert jnp.allclose(out["start_arg1_logits"], ref_logits[..., 2], atol=1e-5)
    assert jnp.allclose(out["end_arg1_logits"],   ref_logits[..., 3], atol=1e-5)
    assert jnp.allclose(out["start_sig_logits"],  ref_logits[..., 4], atol=1e-5)
    assert jnp.allclose(out["end_sig_logits"],    ref_logits[..., 5], atol=1e-5)
    assert jnp.allclose(out["signal_classification_logits"], ref_sig, atol=1e-5)
    assert out["start_arg0_logits"].shape == (B, S)
    assert out["signal_classification_logits"].shape == (B, 2)

    # Secondary check: row count not divisible by the row tile exercises the
    # masked (out-of-bounds) last block path with no explicit padding.
    B2, S2 = 3, 5
    seq2 = jax.random.normal(k_seq2, (B2, S2, H), jnp.float32)
    tok2, sig2 = st2_head(seq2, params["w_cls"], params["b_cls"],
                          params["w_sig"], params["b_sig"], row_tile=8)
    tok2, sig2 = jax.block_until_ready(tok2), jax.block_until_ready(sig2)
    ref_logits2, ref_sig2 = _reference(seq2, params)
    assert jnp.allclose(tok2, ref_logits2, atol=1e-5)
    assert jnp.allclose(sig2, ref_sig2, atol=1e-5)

    print("KERNEL_OK")
</pallas_src>

<mosaic_0001>
module attributes {stable_mosaic.version = 11 : i64} {
  func.func @_fused_head_kernel(%arg0: i32, %arg1: memref<16x32xf32, #tpu.memory_space<vmem>>, %arg2: memref<32x8xf32, #tpu.memory_space<vmem>>, %arg3: memref<1x8xf32, #tpu.memory_space<vmem>>, %arg4: memref<16x8xf32, #tpu.memory_space<vmem>>) attributes {dimension_semantics = [#tpu.dimension_semantics<parallel>], iteration_bounds = array<i64: 1>, scalar_prefetch = 0 : i64, scratch_operands = 0 : i64, tpu.core_type = #tpu.core_type<tc>, window_params = [{transform_indices = @transform_0, window_bounds = array<i64: 16, 32>}, {pipeline_mode = #tpu.pipeline_mode<synchronous>, transform_indices = @transform_1, window_bounds = array<i64: 32, 8>}, {pipeline_mode = #tpu.pipeline_mode<synchronous>, transform_indices = @transform_2, window_bounds = array<i64: 1, 8>}, {transform_indices = @transform_3, window_bounds = array<i64: 16, 8>}]} {
    %c0 = arith.constant 0 : index
    %c0_0 = arith.constant 0 : index
    %0 = vector.load %arg1[%c0, %c0_0] : memref<16x32xf32, #tpu.memory_space<vmem>>, vector<16x32xf32>
    %c0_1 = arith.constant 0 : index
    %c0_2 = arith.constant 0 : index
    %1 = vector.load %arg2[%c0_1, %c0_2] : memref<32x8xf32, #tpu.memory_space<vmem>>, vector<32x8xf32>
    %cst = arith.constant dense<0.000000e+00> : vector<16x8xf32>
    %2 = tpu.matmul %0, %1, %cst {dimension_numbers = #tpu.dot_dimension_numbers<[1], [0], [0], [1], [0, 0, 1, 1], [], []>} : vector<16x32xf32>, vector<32x8xf32>, vector<16x8xf32> -> vector<16x8xf32>
    %c0_3 = arith.constant 0 : index
    %c0_4 = arith.constant 0 : index
    %3 = vector.load %arg3[%c0_3, %c0_4] : memref<1x8xf32, #tpu.memory_space<vmem>>, vector<1x8xf32>
    %4 = vector.broadcast %3 : vector<1x8xf32> to vector<16x8xf32>
    %5 = arith.addf %2, %4 : vector<16x8xf32>
    %c0_5 = arith.constant 0 : index
    %c0_6 = arith.constant 0 : index
    %6 = vector.load %arg4[%c0_5, %c0_6] : memref<16x8xf32, #tpu.memory_space<vmem>>, vector<16x8xf32>
    tpu.vector_store %arg4[%c0_5, %c0_6], %5 {strides = array<i32>} : memref<16x8xf32, #tpu.memory_space<vmem>>, vector<16x8xf32>,
    return
  }
  func.func @transform_0(%arg0: i32) -> (i32, i32) {
    %c0_i32 = arith.constant 0 : i32
    %c0_i32_0 = arith.constant 0 : i32
    return %arg0, %c0_i32 : i32, i32
  }
  func.func @transform_1(%arg0: i32) -> (i32, i32) {
    %c0_i32 = arith.constant 0 : i32
    %c0_i32_0 = arith.constant 0 : i32
    %c0_i32_1 = arith.constant 0 : i32
    return %c0_i32, %c0_i32_0 : i32, i32
  }
  func.func @transform_2(%arg0: i32) -> (i32, i32) {
    %c0_i32 = arith.constant 0 : i32
    %c0_i32_0 = arith.constant 0 : i32
    %c0_i32_1 = arith.constant 0 : i32
    return %c0_i32, %c0_i32_0 : i32, i32
  }
  func.func @transform_3(%arg0: i32) -> (i32, i32) {
    %c0_i32 = arith.constant 0 : i32
    %c0_i32_0 = arith.constant 0 : i32
    return %arg0, %c0_i32 : i32, i32
  }
}

</mosaic_0001>

<bundles_post_ra>
// kernel: tpu_custom_call.1
= control target key start
LH: loop header
LB: loop body
LE: loop exit
PB: predicated region body
PF: predicated region fallthrough
CT: control target
= control target key end

     0   :  { %vm24_vm0 = vcmask 261120   ;;  %vm54_vm1 = vcmask 64512   ;;  %s115_s1 = inlined_call_operand.vmem [shape: f32[32,8], index: 1, kind: input, shape index: {}]   ;;  %s116_s2 = inlined_call_operand.vmem [shape: f32[1,8], index: 2, kind: input, shape index: {}]   ;;  %s117_s0 = inlined_call_operand.vmem [shape: f32[16,32], index: 0, kind: input, shape index: {}]   ;;  %s118_s3 = inlined_call_operand.vmem [shape: f32[16,8], index: 3, kind: output, shape index: {}]  }
   0x1   :  { %v19_v0 = vld [vmem:[%s115_s1 + $0x18] sm:$0xff]  ;;  %v18_v1 = vld [vmem:[%s115_s1 + $0x10] sm:$0xff]  ;;  %v17_v2 = vld [vmem:[%s115_s1 + $0x8] sm:$0xff] }
   0x2   :  { %43 = vmatpush.msra.mxu0 %v19_v0  ;;  %63 = vmatpush.msra.mxu1 %v19_v0  ;;  %v16_v3 = vld [vmem:[%s115_s1] sm:$0xff]  ;;  %v15_v5 = vld [vmem:[%s117_s0 + $0x8] sm:$0xff] }
   0x3   :  { %v14_v4 = vld [vmem:[%s117_s0] sm:$0xff] }
   0x4   :  { %44 = vmatpush.msra.mxu0 %v18_v1  ;;  %64 = vmatpush.msra.mxu1 %v18_v1  ;;  %v67_v6 = vld [vmem:[%s116_s2] ss:$0 sm:$0xff] }
   0x6   :  { %45 = vmatpush.msra.mxu0 %v17_v2  ;;  %65 = vmatpush.msra.mxu1 %v17_v2 }
   0x8   :  { %46 = vmatpush.msra.mxu0 %v16_v3  ;;  %66 = vmatpush.msra.mxu1 %v16_v3 }
   0x9   :  { %61 = vmatmul.msk.f32.vlgmr.msra.gmra.mxu0 %vm24_vm0, %v14_v4  ;;  %62 = vmatmul.msk.f32.vlgmr.msra.gmra.mxu1 %vm24_vm0, %v15_v5 }
  0x86   :  { %v48_v7 = vpop.f32.mrf.mxu0  ;;  %v51_v8 = vpop.f32.mrf.mxu1 }
  0x87   :  { %v49_v9 = vadd.f32 %v67_v6, %v48_v7  ;;  %v52_v10 = vadd.f32 %v67_v6, %v51_v8 }
  0x89   :  { %55 = vst.msk [vmem:[%s118_s3] sm:$0xff] %vm54_vm1, %v49_v9 }
  0x8a   :  { %56 = vst.msk [vmem:[%s118_s3 + $0x8] sm:$0xff] %vm54_vm1, %v52_v10 }

</bundles_post_ra>
